<compile_context>
chip_gen: v6e
topology: v6e:2x2x1
jax: 0.10.0
libtpu: 0.0.40
codegen_flags: <defaults>
</compile_context>

<pallas_src>
import numpy as np
import jax
import jax.numpy as jnp
from jax.experimental import pallas as pl
from jax.experimental.pallas import tpu as pltpu

C1 = float(np.sqrt(3.0 / (4.0 * np.pi)))   # orthonormal real SH l=1 prefactor
HIDDEN = 32
N_PATH = 16                 # mul_out
L_OUT = 1
M_OUT = 2 * L_OUT + 1       # 3
N_OUT = N_PATH * M_OUT      # 48, lane-packed (u, m) output width
HID1 = HIDDEN + 1           # 33: extra constant-1 unit carries the layer-2 bias


def _cdiv(a, b):
    return -(-a // b)


def _round_up(a, m):
    return _cdiv(a, m) * m


def _ares_kernel(r_ref, w1a_ref, b1a_ref, w2a_ref, sel_ref, out_ref):
    # r_ref:   [tb, 3]    one point per sublane, (x, y, z) in lanes
    # w1a_ref: [1, 33]    [w1 | 0]
    # b1a_ref: [1, 33]    [b1 | 1]      (col 32 makes h[:,32] == 1 after ReLU)
    # w2a_ref: [33, 48]   [w2 columns replicated x3 ; b2 replicated x3]
    # sel_ref: [3, 48]    2*C1 * (x,y,z)->(y,z,x) permutation selector, tiled x16
    # out_ref: [tb, 48]   lane-packed output, column 3*u + m
    r = r_ref[...]                                          # [tb, 3]
    r2 = jnp.sum(r * r, axis=-1, keepdims=True)             # [tb, 1]  (XLU reduce)
    nonzero = r2 > 0.0
    inv_r = jnp.where(nonzero, jax.lax.rsqrt(r2), 0.0)      # 1/|r|, 0 at r == 0 (EUP)
    radii_c = jnp.maximum(jnp.sqrt(r2), 1e-4)               # torch.clamp(min=0.0001)

    # (-Y) expanded to 48 lanes: lane 3u+m = 2*C1 * perm(r)[m] / |r| (0 at r==0).
    # Permutation and the 2*C1 factor live in sel_ref -> one small MXU matmul.
    p3 = inv_r * r                                          # [tb, 3]
    y48 = jnp.dot(p3, sel_ref[...],
                  preferred_element_type=jnp.float32)       # [tb, 48]

    # RadialModel 1 -> 32 -> 16 on the MXU; h[:, 32] == 1 carries b2 into the
    # second matmul so no [tb,48] bias add is needed on the VPU.
    h = jnp.maximum(
        jnp.dot(radii_c, w1a_ref[...], preferred_element_type=jnp.float32)
        + b1a_ref[...],
        0.0)                                                # [tb, 33]
    r48 = jnp.dot(h, w2a_ref[...],
                  preferred_element_type=jnp.float32)       # [tb, 48]

    out_ref[...] = r48 * y48


def _prefer_two_grid_steps():
    # Only v7x has 2 TensorCores per chip; on v5e/v6e splitting the grid just
    # adds per-step overhead.
    try:
        return "v7" in jax.devices()[0].device_kind.lower()
    except Exception:
        return False


def ares_kernel_forward(r, w1, b1, w2, b2, *, tile_b=8192):
    """r: [..., 3] -> [B_flat, n_path, 2*l_out+1]."""
    r_flat = jnp.asarray(r, jnp.float32).reshape(-1, 3)
    B = r_flat.shape[0]

    # Tile selection: largest tile that fits the VMEM budget; keep >= 2 grid
    # steps only on 2-TensorCore chips; rebalance to minimize padding.
    tb = max(8, min(int(tile_b), _round_up(B, 8)))
    if _prefer_two_grid_steps() and B >= 1024:
        tb = min(tb, _round_up(_cdiv(B, 2), 8))
    n_tiles = _cdiv(B, tb)
    tb = _round_up(_cdiv(B, n_tiles), 8)
    B_pad = n_tiles * tb
    if B_pad != B:
        r_flat = jnp.pad(r_flat, ((0, B_pad - B), (0, 0)))  # zero rows -> zero output

    w1 = jnp.asarray(w1, jnp.float32).reshape(1, HIDDEN)
    b1 = jnp.asarray(b1, jnp.float32).reshape(1, HIDDEN)
    w2 = jnp.asarray(w2, jnp.float32).reshape(HIDDEN, N_PATH)
    b2 = jnp.asarray(b2, jnp.float32).reshape(1, N_PATH)

    # Augmented weights: extra hidden unit that is constant 1 (carries b2).
    w1a = jnp.concatenate([w1, jnp.zeros((1, 1), jnp.float32)], axis=1)   # [1, 33]
    b1a = jnp.concatenate([b1, jnp.ones((1, 1), jnp.float32)], axis=1)    # [1, 33]
    w2rep = jnp.repeat(w2, M_OUT, axis=1)                                  # [32, 48]
    b2rep = jnp.repeat(b2, M_OUT, axis=1)                                  # [1, 48]
    w2a = jnp.concatenate([w2rep, b2rep], axis=0)                          # [33, 48]

    # Constant selector: column 3u+m takes component m of (y, z, x), scaled by 2*C1
    # (SH prefactor * the filter_order==1 scaling * the effective CG sign).
    perm = np.zeros((3, 3), np.float32)
    perm[1, 0] = perm[2, 1] = perm[0, 2] = 1.0
    selperm = jnp.asarray(np.tile(perm, (1, N_PATH)) * (2.0 * C1))         # [3, 48]

    weight_bytes = 4 * (2 * HID1 + HID1 * N_OUT + 3 * N_OUT)
    cost = pl.CostEstimate(
        flops=int(B_pad) * (2 * HID1 + 2 * HID1 * N_OUT + 2 * 3 * N_OUT + 8 * N_OUT),
        transcendentals=int(2 * B_pad),
        bytes_accessed=int(B_pad * 4 * (3 + N_OUT)) + weight_bytes,
    )

    out48 = pl.pallas_call(
        _ares_kernel,
        out_shape=jax.ShapeDtypeStruct((B_pad, N_OUT), jnp.float32),
        grid_spec=pltpu.PrefetchScalarGridSpec(
            num_scalar_prefetch=0,
            grid=(n_tiles,),
            in_specs=[
                pl.BlockSpec((tb, 3), lambda i: (i, 0)),
                pl.BlockSpec((1, HID1), lambda i: (0, 0)),
                pl.BlockSpec((1, HID1), lambda i: (0, 0)),
                pl.BlockSpec((HID1, N_OUT), lambda i: (0, 0)),
                pl.BlockSpec((3, N_OUT), lambda i: (0, 0)),
            ],
            out_specs=pl.BlockSpec((tb, N_OUT), lambda i: (i, 0)),
        ),
        compiler_params=pltpu.CompilerParams(
            dimension_semantics=("parallel",),
            vmem_limit_bytes=32 * 1024 * 1024,
        ),
        cost_estimate=cost,
    )(r_flat, w1a, b1a, w2a, selperm)

    out48 = out48[:B]                                   # drop padded rows
    return out48.reshape(B, N_PATH, M_OUT)              # free contiguous reshape


def reference_forward(r, w1, b1, w2, b2):
    """Pure-JAX reference of the same math (sanity check)."""
    r_flat = jnp.asarray(r, jnp.float32).reshape(-1, 3)
    w1 = jnp.asarray(w1, jnp.float32)
    b1 = jnp.asarray(b1, jnp.float32)
    w2 = jnp.asarray(w2, jnp.float32)
    b2 = jnp.asarray(b2, jnp.float32)
    radii = jnp.sqrt(jnp.sum(r_flat * r_flat, axis=1, keepdims=True))
    safe = jnp.where(radii == 0.0, 1.0, radii)
    Y = C1 * r_flat[:, jnp.array([1, 2, 0])] / safe
    Y = jnp.where(radii == 0.0, 0.0, Y) * (-2.0)
    radii_c = jnp.maximum(radii, 1e-4)
    h = jnp.maximum(radii_c * w1 + b1, 0.0)
    R = h @ w2 + b2
    return jnp.einsum('zu,zi->zui', R, -Y)


if __name__ == "__main__":
    key = jax.random.PRNGKey(0)
    k_r, k_w1, k_b1, k_w2, k_b2 = jax.random.split(key, 5)

    # small input: r of shape [2, 64, 3]  (flattened batch = 128)
    r = jax.random.normal(k_r, (2, 64, 3), dtype=jnp.float32)

    # deterministic RadialModel parameters (2-layer MLP: 1 -> 32 -> 16)
    w1 = jax.random.normal(k_w1, (1, HIDDEN), dtype=jnp.float32)
    b1 = 0.1 * jax.random.normal(k_b1, (1, HIDDEN), dtype=jnp.float32)
    w2 = jax.random.normal(k_w2, (HIDDEN, N_PATH), dtype=jnp.float32) / np.sqrt(HIDDEN)
    b2 = 0.1 * jax.random.normal(k_b2, (1, N_PATH), dtype=jnp.float32)

    out = jax.block_until_ready(ares_kernel_forward(r, w1, b1, w2, b2))
    ref = jax.block_until_ready(reference_forward(r, w1, b1, w2, b2))
    assert out.shape == (128, N_PATH, M_OUT), out.shape
    assert jnp.allclose(out, ref, atol=1e-4, rtol=1e-4), \
        float(jnp.max(jnp.abs(out - ref)))

    # ragged batch with a zero-radius row (cdiv grid, zero padding, r==0 branch)
    r2_in = jax.random.normal(jax.random.PRNGKey(1), (100, 3), dtype=jnp.float32)
    r2_in = r2_in.at[0, :].set(0.0)
    out2 = jax.block_until_ready(ares_kernel_forward(r2_in, w1, b1, w2, b2))
    ref2 = jax.block_until_ready(reference_forward(r2_in, w1, b1, w2, b2))
    assert out2.shape == (100, N_PATH, M_OUT), out2.shape
    assert jnp.allclose(out2, ref2, atol=1e-4, rtol=1e-4), \
        float(jnp.max(jnp.abs(out2 - ref2)))

    # larger batch with an explicit smaller tile -> multiple grid steps + rebalance
    r3_in = jax.random.normal(jax.random.PRNGKey(2), (9000, 3), dtype=jnp.float32)
    out3 = jax.block_until_ready(
        ares_kernel_forward(r3_in, w1, b1, w2, b2, tile_b=4096))
    ref3 = jax.block_until_ready(reference_forward(r3_in, w1, b1, w2, b2))
    assert out3.shape == (9000, N_PATH, M_OUT), out3.shape
    assert jnp.allclose(out3, ref3, atol=1e-4, rtol=1e-4), \
        float(jnp.max(jnp.abs(out3 - ref3)))

    print("KERNEL_OK")
</pallas_src>

<mosaic_0001>
module attributes {stable_mosaic.version = 11 : i64} {
  func.func @_ares_kernel(%arg0: i32, %arg1: memref<128x3xf32, #tpu.memory_space<vmem>>, %arg2: memref<1x33xf32, #tpu.memory_space<vmem>>, %arg3: memref<1x33xf32, #tpu.memory_space<vmem>>, %arg4: memref<33x48xf32, #tpu.memory_space<vmem>>, %arg5: memref<3x48xf32, #tpu.memory_space<vmem>>, %arg6: memref<128x48xf32, #tpu.memory_space<vmem>>) attributes {dimension_semantics = [#tpu.dimension_semantics<parallel>], iteration_bounds = array<i64: 1>, scalar_prefetch = 0 : i64, scratch_operands = 0 : i64, tpu.core_type = #tpu.core_type<tc>, window_params = [{transform_indices = @transform_0, window_bounds = array<i64: 128, 3>}, {pipeline_mode = #tpu.pipeline_mode<synchronous>, transform_indices = @transform_1, window_bounds = array<i64: 1, 33>}, {pipeline_mode = #tpu.pipeline_mode<synchronous>, transform_indices = @transform_2, window_bounds = array<i64: 1, 33>}, {pipeline_mode = #tpu.pipeline_mode<synchronous>, transform_indices = @transform_3, window_bounds = array<i64: 33, 48>}, {pipeline_mode = #tpu.pipeline_mode<synchronous>, transform_indices = @transform_4, window_bounds = array<i64: 3, 48>}, {transform_indices = @transform_5, window_bounds = array<i64: 128, 48>}]} {
    %c0 = arith.constant 0 : index
    %c0_0 = arith.constant 0 : index
    %0 = vector.load %arg1[%c0, %c0_0] : memref<128x3xf32, #tpu.memory_space<vmem>>, vector<128x3xf32>
    %1 = arith.mulf %0, %0 : vector<128x3xf32>
    %cst = arith.constant dense<0.000000e+00> : vector<128xf32>
    %2 = vector.multi_reduction <add>, %1, %cst [1] : vector<128x3xf32> to vector<128xf32>
    %3 = vector.shape_cast %2 : vector<128xf32> to vector<128x1xf32>
    %cst_1 = arith.constant 0.000000e+00 : f32
    %4 = vector.broadcast %cst_1 : f32 to vector<128x1xf32>
    %5 = arith.cmpf ogt, %3, %4 : vector<128x1xf32>
    %6 = math.rsqrt %3 : vector<128x1xf32>
    %cst_2 = arith.constant 0.000000e+00 : f32
    %7 = vector.broadcast %cst_2 : f32 to vector<128x1xf32>
    %8 = arith.select %5, %6, %7 : vector<128x1xi1>, vector<128x1xf32>
    %9 = math.sqrt %3 : vector<128x1xf32>
    %cst_3 = arith.constant 9.99999974E-5 : f32
    %10 = vector.broadcast %cst_3 : f32 to vector<128x1xf32>
    %11 = arith.maximumf %9, %10 : vector<128x1xf32>
    %12 = vector.broadcast %8 : vector<128x1xf32> to vector<128x3xf32>
    %13 = arith.mulf %12, %0 : vector<128x3xf32>
    %c0_4 = arith.constant 0 : index
    %c0_5 = arith.constant 0 : index
    %14 = vector.load %arg5[%c0_4, %c0_5] : memref<3x48xf32, #tpu.memory_space<vmem>>, vector<3x48xf32>
    %cst_6 = arith.constant dense<0.000000e+00> : vector<128x48xf32>
    %15 = tpu.matmul %13, %14, %cst_6 {dimension_numbers = #tpu.dot_dimension_numbers<[1], [0], [0], [1], [0, 0, 1, 1], [], []>} : vector<128x3xf32>, vector<3x48xf32>, vector<128x48xf32> -> vector<128x48xf32>
    %c0_7 = arith.constant 0 : index
    %c0_8 = arith.constant 0 : index
    %16 = vector.load %arg2[%c0_7, %c0_8] : memref<1x33xf32, #tpu.memory_space<vmem>>, vector<1x33xf32>
    %cst_9 = arith.constant dense<0.000000e+00> : vector<128x33xf32>
    %17 = tpu.matmul %11, %16, %cst_9 {dimension_numbers = #tpu.dot_dimension_numbers<[1], [0], [0], [1], [0, 0, 1, 1], [], []>} : vector<128x1xf32>, vector<1x33xf32>, vector<128x33xf32> -> vector<128x33xf32>
    %c0_10 = arith.constant 0 : index
    %c0_11 = arith.constant 0 : index
    %18 = vector.load %arg3[%c0_10, %c0_11] : memref<1x33xf32, #tpu.memory_space<vmem>>, vector<1x33xf32>
    %19 = vector.broadcast %18 : vector<1x33xf32> to vector<128x33xf32>
    %20 = arith.addf %17, %19 : vector<128x33xf32>
    %cst_12 = arith.constant 0.000000e+00 : f32
    %21 = vector.broadcast %cst_12 : f32 to vector<128x33xf32>
    %22 = arith.maximumf %20, %21 : vector<128x33xf32>
    %c0_13 = arith.constant 0 : index
    %c0_14 = arith.constant 0 : index
    %23 = vector.load %arg4[%c0_13, %c0_14] : memref<33x48xf32, #tpu.memory_space<vmem>>, vector<33x48xf32>
    %cst_15 = arith.constant dense<0.000000e+00> : vector<128x48xf32>
    %24 = tpu.matmul %22, %23, %cst_15 {dimension_numbers = #tpu.dot_dimension_numbers<[1], [0], [0], [1], [0, 0, 1, 1], [], []>} : vector<128x33xf32>, vector<33x48xf32>, vector<128x48xf32> -> vector<128x48xf32>
    %25 = arith.mulf %24, %15 : vector<128x48xf32>
    %c0_16 = arith.constant 0 : index
    %c0_17 = arith.constant 0 : index
    %26 = vector.load %arg6[%c0_16, %c0_17] : memref<128x48xf32, #tpu.memory_space<vmem>>, vector<128x48xf32>
    tpu.vector_store %arg6[%c0_16, %c0_17], %25 {strides = array<i32>} : memref<128x48xf32, #tpu.memory_space<vmem>>, vector<128x48xf32>,
    return
  }
  func.func @transform_0(%arg0: i32) -> (i32, i32) {
    %c0_i32 = arith.constant 0 : i32
    %c0_i32_0 = arith.constant 0 : i32
    return %arg0, %c0_i32 : i32, i32
  }
  func.func @transform_1(%arg0: i32) -> (i32, i32) {
    %c0_i32 = arith.constant 0 : i32
    %c0_i32_0 = arith.constant 0 : i32
    %c0_i32_1 = arith.constant 0 : i32
    return %c0_i32, %c0_i32_0 : i32, i32
  }
  func.func @transform_2(%arg0: i32) -> (i32, i32) {
    %c0_i32 = arith.constant 0 : i32
    %c0_i32_0 = arith.constant 0 : i32
    %c0_i32_1 = arith.constant 0 : i32
    return %c0_i32, %c0_i32_0 : i32, i32
  }
  func.func @transform_3(%arg0: i32) -> (i32, i32) {
    %c0_i32 = arith.constant 0 : i32
    %c0_i32_0 = arith.constant 0 : i32
    %c0_i32_1 = arith.constant 0 : i32
    return %c0_i32, %c0_i32_0 : i32, i32
  }
  func.func @transform_4(%arg0: i32) -> (i32, i32) {
    %c0_i32 = arith.constant 0 : i32
    %c0_i32_0 = arith.constant 0 : i32
    %c0_i32_1 = arith.constant 0 : i32
    return %c0_i32, %c0_i32_0 : i32, i32
  }
  func.func @transform_5(%arg0: i32) -> (i32, i32) {
    %c0_i32 = arith.constant 0 : i32
    %c0_i32_0 = arith.constant 0 : i32
    return %arg0, %c0_i32 : i32, i32
  }
}

</mosaic_0001>

<bundles_post_ra>
// kernel: tpu_custom_call.1
= control target key start
LH: loop header
LB: loop body
LE: loop exit
PB: predicated region body
PF: predicated region fallthrough
CT: control target
= control target key end

     0   :  { %vm52_vm0 = vcmask 23552   ;;  %vm342_vm1 = vcmask 1042432   ;;  %vm548_vm2 = vcmask 1040384   ;;  %vm499_vm15 = vcmask 7168   ;;  %s1748_s0 = inlined_call_operand.vmem [shape: f32[128,3], index: 0, kind: input, shape index: {}]   ;;  %s1749_s4 = inlined_call_operand.vmem [shape: f32[3,48], index: 4, kind: input, shape index: {}]   ;;  %s1750_s1 = inlined_call_operand.vmem [shape: f32[1,33], index: 1, kind: input, shape index: {}]   ;;  %s1751_s3 = inlined_call_operand.vmem [shape: f32[33,48], index: 3, kind: input, shape index: {}]   ;;  %s1752_s2 = inlined_call_operand.vmem [shape: f32[1,33], index: 2, kind: input, shape index: {}]   ;;  %s1753_s5 = inlined_call_operand.vmem [shape: f32[128,48], index: 5, kind: output, shape index: {}]  }
   0x1   :  { %v1212_v0 = vld [vmem:[%s1748_s0 + $0x50] sm:$0xff]  ;;  %v1217_v1 = vld [vmem:[%s1748_s0 + $0x40] sm:$0xff]  ;;  %v1222_v2 = vld [vmem:[%s1748_s0 + $0x58] sm:$0xff] }
   0x2   :  { %v46_v3 = vmul.f32 %v1212_v0, %v1212_v0  ;;  %v44_v4 = vmul.f32 %v1217_v1, %v1217_v1  ;;  %v47_v5 = vmul.f32 %v1222_v2, %v1222_v2  ;;  %v1233_v6 = vld [vmem:[%s1748_s0 + $0x48] sm:$0xff]  ;;  %v1245_v9 = vld [vmem:[%s1748_s0 + $0x60] sm:$0xff]  ;;  %v1258_v16 = vld [vmem:[%s1748_s0 + $0x70] sm:$0xff] }
   0x3   :  { %v45_v7 = vmul.f32 %v1233_v6, %v1233_v6  ;;  %v1240_v8 = vld [vmem:[%s1748_s0 + $0x68] sm:$0xff]  ;;  %v48_v15 = vmul.f32 %v1245_v9, %v1245_v9  ;;  %v1263_v17 = vld [vmem:[%s1748_s0] sm:$0xff]  ;;  %v50_v20 = vmul.f32 %v1258_v16, %v1258_v16  ;;  %v1274_v22 = vld [vmem:[%s1748_s0 + $0x78] sm:$0xff] }
   0x4   :  { %v83_v10 = vsel %vm52_vm0, %v46_v3, 0.0  ;;  %v77_v11 = vsel %vm52_vm0, %v44_v4, 0.0  ;;  %v86_v12 = vsel %vm52_vm0, %v47_v5, 0.0  ;;  %v49_v14 = vmul.f32 %v1240_v8, %v1240_v8  ;;  %v1279_v23 = vld [vmem:[%s1748_s0 + $0x8] sm:$0xff]  ;;  %v1290_v28 = vld [vmem:[%s1748_s0 + $0x10] sm:$0xff]  ;;  %v1295_v29 = vld [vmem:[%s1748_s0 + $0x18] sm:$0xff] }
   0x5   :  { %84 = vadd.xlane.f32.xlu1 %v83_v10  ;;  %78 = vadd.xlane.f32.xlu0 %v77_v11  ;;  %v80_v13 = vsel %vm52_vm0, %v45_v7, 0.0  ;;  %v89_v19 = vsel %vm52_vm0, %v48_v15, 0.0  ;;  %v36_v21 = vmul.f32 %v1263_v17, %v1263_v17  ;;  %v95_v24 = vsel %vm52_vm0, %v50_v20, 0.0  ;;  %v1306_v34 = vld [vmem:[%s1748_s0 + $0x20] sm:$0xff]  ;;  %v1311_v35 = vld [vmem:[%s1748_s0 + $0x28] sm:$0xff]  ;;  %v1322_v40 = vld [vmem:[%s1748_s0 + $0x30] sm:$0xff] }
   0x6   :  { %v92_v18 = vsel %vm52_vm0, %v49_v14, 0.0  ;;  %v51_v26 = vmul.f32 %v1274_v22, %v1274_v22  ;;  %v37_v27 = vmul.f32 %v1279_v23, %v1279_v23  ;;  %v38_v32 = vmul.f32 %v1290_v28, %v1290_v28  ;;  %v1327_v41 = vld [vmem:[%s1748_s0 + $0x38] sm:$0xff]  ;;  %v293_v48 = vld [vmem:[%s1749_s4] sm:$0x7] }
   0x7   :  { %v53_v25 = vsel %vm52_vm0, %v36_v21, 0.0  ;;  %v39_v33 = vmul.f32 %v1295_v29, %v1295_v29  ;;  %v40_v38 = vmul.f32 %v1306_v34, %v1306_v34  ;;  %v41_v39 = vmul.f32 %v1311_v35, %v1311_v35  ;;  %1145 = vmatprep.subr.msk.mxu1 %vm342_vm1, %v293_v48  ;;  %1059 = vmatprep.subr.msk.mxu0 %vm342_vm1, %v293_v48  ;;  %v491_v49 = vld [vmem:[%s1750_s1] sm:$0x1] }
   0x8   :  { %v98_v30 = vsel %vm52_vm0, %v51_v26, 0.0  ;;  %v56_v31 = vsel %vm52_vm0, %v37_v27, 0.0  ;;  %v59_v36 = vsel %vm52_vm0, %v38_v32, 0.0  ;;  %v42_v44 = vmul.f32 %v1322_v40, %v1322_v40  ;;  %1146 = vmatpush3.msk.msra.mxu1 %vm342_vm1, %v293_v48  ;;  %1060 = vmatpush3.msk.msra.mxu0 %vm342_vm1, %v293_v48 }
   0x9   :  { %87 = vadd.xlane.f32.xlu1 %v86_v12  ;;  %81 = vadd.xlane.f32.xlu0 %v80_v13  ;;  %v62_v37 = vsel %vm52_vm0, %v39_v33, 0.0  ;;  %v65_v42 = vsel %vm52_vm0, %v40_v38, 0.0  ;;  %v68_v43 = vsel %vm52_vm0, %v41_v39, 0.0  ;;  %v43_v45 = vmul.f32 %v1327_v41, %v1327_v41 }
   0xa   :  { %v71_v46 = vsel %vm52_vm0, %v42_v44, 0.0  ;;  %1085 = vmatprep.subr.msk.mxu1 %vm548_vm2, %v491_v49 }
   0xb   :  { %v74_v47 = vsel %vm52_vm0, %v43_v45, 0.0 }
   0xd   :  { %93 = vadd.xlane.f32.xlu1 %v92_v18  ;;  %90 = vadd.xlane.f32.xlu0 %v89_v19 }
  0x11   :  { %96 = vadd.xlane.f32.xlu0 %v95_v24  ;;  %54 = vadd.xlane.f32.xlu1 %v53_v25 }
  0x15   :  { %99 = vadd.xlane.f32.xlu0 %v98_v30  ;;  %57 = vadd.xlane.f32.xlu1 %v56_v31 }
  0x19   :  { %60 = vadd.xlane.f32.xlu0 %v59_v36  ;;  %63 = vadd.xlane.f32.xlu1 %v62_v37 }
  0x1d   :  { %66 = vadd.xlane.f32.xlu0 %v65_v42  ;;  %69 = vadd.xlane.f32.xlu1 %v68_v43 }
  0x21   :  { %72 = vadd.xlane.f32.xlu0 %v71_v46  ;;  %75 = vadd.xlane.f32.xlu1 %v74_v47 }
  0x8e   :  { %v1344_v50 = vpop.xlane.xlu1 %84  ;;  %v1346_v51 = vpop.xlane.xlu0 %78 }
  0x8f   :  { %1147 = vrsqrt.f32 %v1346_v51  ;;  %vm109_vm3 = vcmp.gt.f32.partialorder %v1346_v51, 0.0  ;;  %vm111_vm4 = vcmp.gt.f32.partialorder %v1344_v50, 0.0  ;;  %vm207_vm6 = vcmp.eq.f32.partialorder %v1346_v51, inf }
  0x90   :  { %1149 = vrsqrt.f32 %v1344_v50  ;;  %v210_v12 = vand.u32 2147483648, %v1346_v51 }
  0x92   :  { %v1350_v52 = vpop.xlane.xlu1 %87  ;;  %v1352_v53 = vpop.xlane.xlu0 %81 }
  0x93   :  { %1151 = vrsqrt.f32 %v1350_v52  ;;  %vm110_vm5 = vcmp.gt.f32.partialorder %v1352_v53, 0.0  ;;  %vm112_vm7 = vcmp.gt.f32.partialorder %v1350_v52, 0.0 }
  0x94   :  { %1153 = vrsqrt.f32 %v1352_v53 }
  0x96   :  { %v1356_v54 = vpop.xlane.xlu1 %93  ;;  %v1358_v55 = vpop.xlane.xlu0 %90 }
  0x97   :  { %1155 = vrsqrt.f32 %v1356_v54  ;;  %vm113_vm8 = vcmp.gt.f32.partialorder %v1358_v55, 0.0  ;;  %vm114_vm9 = vcmp.gt.f32.partialorder %v1356_v54, 0.0 }
  0x98   :  { %1157 = vrsqrt.f32 %v1358_v55 }
  0x9a   :  { %v1362_v56 = vpop.xlane.xlu0 %96  ;;  %v1364_v57 = vpop.xlane.xlu1 %54 }
  0x9b   :  { %1159 = vrsqrt.f32 %v1362_v56  ;;  %vm101_vm10 = vcmp.gt.f32.partialorder %v1364_v57, 0.0  ;;  %vm115_vm11 = vcmp.gt.f32.partialorder %v1362_v56, 0.0  ;;  %vm151_vm12 = vcmp.eq.f32.partialorder %v1364_v57, inf }
  0x9c   :  { %1161 = vrsqrt.f32 %v1364_v57  ;;  %v1148_v58 = vpop.eup %1147  ;;  %vm153_vm13 = vcmp.eq.f32.partialorder %v1364_v57, 0.0  ;;  %v154_v21 = vand.u32 2147483648, %v1364_v57 }
  0x9d   :  { %v1150_v59 = vpop.eup %1149  ;;  %v141_v62 = vsel %vm109_vm3, %v1148_v58, 0.0 }
  0x9e   :  { %v1369_v60 = vpop.xlane.xlu0 %99  ;;  %v1371_v61 = vpop.xlane.xlu1 %57  ;;  %v285_v3 = vmul.f32 %v141_v62, %v1217_v1  ;;  %v143_v5 = vsel %vm111_vm4, %v1150_v59, 0.0  ;;  %v1416_v24 = vmul.f32 %v1150_v59, %v1344_v50 }
  0x9f   :  { %1163 = vrsqrt.f32 %v1369_v60  ;;  %v287_v14 = vmul.f32 %v143_v5, %v1212_v0  ;;  %vm158_vm14 = vcmp.eq.f32.partialorder %v1371_v61, inf  ;;  %vm160_vm1 = vcmp.eq.f32.partialorder %v1371_v61, 0.0 }
  0xa0   :  { %v1374_v63 = vpop.eup %1151  ;;  %1165 = vrsqrt.f32 %v1371_v61  ;;  %1073 = vmatprep.mubr.msk.f32.mxu1 %vm52_vm0, %v285_v3  ;;  %v161_v30 = vand.u32 2147483648, %v1371_v61  ;;  %vm102_vm3 = vcmp.gt.f32.partialorder %v1371_v61, 0.0  ;;  %vm116_vm4 = vcmp.gt.f32.partialorder %v1369_v60, 0.0 }
  0xa1   :  { %v1154_v4 = vpop.eup %1153  ;;  %v144_v15 = vsel %vm112_vm7, %v1374_v63, 0.0 }
  0xa2   :  { %v1381_v7 = vpop.xlane.xlu0 %60  ;;  %v1383_v10 = vpop.xlane.xlu1 %63  ;;  %v142_v11 = vsel %vm110_vm5, %v1154_v4, 0.0  ;;  %v288_v25 = vmul.f32 %v144_v15, %v1222_v2  ;;  %v1442_v33 = vmul.f32 %v1154_v4, %v1352_v53 }
  0xa3   :  { %1167 = vrsqrt.f32 %v1381_v7  ;;  %v286_v1 = vmul.f32 %v142_v11, %v1233_v6  ;;  %v206_v6 = vmul.f32 %v1148_v58, %v1346_v51  ;;  %vm103_vm5 = vcmp.gt.f32.partialorder %v1381_v7, 0.0 }
  0xa4   :  { %v1391_v13 = vpop.eup %1155  ;;  %1169 = vrsqrt.f32 %v1383_v10  ;;  %vm165_vm7 = vcmp.eq.f32.partialorder %v1381_v7, inf  ;;  %v168_v48 = vand.u32 2147483648, %v1381_v7  ;;  %v175_v59 = vand.u32 2147483648, %v1383_v10 }
  0xa5   :  { %v1397_v18 = vpop.eup %1157  ;;  %1074 = vmatmul.mubr.msk.f32.vlgmr.msra.gmra.mxu1 %vm52_vm0, %v286_v1  ;;  %v146_v31 = vsel %vm114_vm9, %v1391_v13, 0.0  ;;  %vm172_vm9 = vcmp.eq.f32.partialorder %v1383_v10, inf }
  0xa6   :  { %1086 = vmatpush3.msk.msra.mxu1 %vm548_vm2, %v491_v49  ;;  %1076 = vmatprep.mubr.msk.f32.mxu1 %vm52_vm0, %v287_v14  ;;  %v1406_v0 = vpop.xlane.xlu0 %66  ;;  %v1408_v19 = vpop.xlane.xlu1 %69  ;;  %v145_v20 = vsel %vm113_vm8, %v1397_v18, 0.0  ;;  %v290_v43 = vmul.f32 %v146_v31, %v1240_v8  ;;  %vm167_vm8 = vcmp.eq.f32.partialorder %v1381_v7, 0.0 }
  0xa7   :  { %1171 = vrsqrt.f32 %v1406_v0  ;;  %v289_v26 = vmul.f32 %v145_v20, %v1245_v9  ;;  %v1439_v9 = vsel %vm207_vm6, %v1346_v51, %v206_v6  ;;  %vm104_vm6 = vcmp.gt.f32.partialorder %v1383_v10, 0.0 }
  0xa8   :  { %v1422_v27 = vpop.eup %1159  ;;  %1173 = vrsqrt.f32 %v1408_v19  ;;  %v182_v1 = vand.u32 2147483648, %v1406_v0 }
  0xa9   :  { %v1162_v32 = vpop.eup %1161  ;;  %1077 = vmatmul.mubr.msk.f32.gmra.mxu1 %vm52_vm0, %v288_v25  ;;  %v147_v2 = vsel %vm115_vm11, %v1422_v27, 0.0  ;;  %vm105_vm11 = vcmp.gt.f32.partialorder %v1406_v0, 0.0 }
  0xaa   :  { %1079 = vmatprep.mubr.msk.f32.mxu1 %vm52_vm0, %v289_v26  ;;  %v1445_v36 = vpop.xlane.xlu0 %72  ;;  %v1447_v37 = vpop.xlane.xlu1 %75  ;;  %v133_v38 = vsel %vm101_vm10, %v1162_v32, 0.0  ;;  %v291_v39 = vmul.f32 %v147_v2, %v1258_v16  ;;  %v150_v42 = vmul.f32 %v1162_v32, %v1364_v57  ;;  %vm174_vm10 = vcmp.eq.f32.partialorder %v1383_v10, 0.0 }
  0xab   :  { %1175 = vrsqrt.f32 %v1445_v36  ;;  %v277_v45 = vmul.f32 %v133_v38, %v1263_v17  ;;  %v189_v26 = vand.u32 2147483648, %v1408_v19 }
  0xac   :  { %v1458_v44 = vpop.eup %1163  ;;  %1177 = vrsqrt.f32 %v1447_v37  ;;  %v152_v16 = vsel %vm151_vm12, %v1364_v57, %v150_v42  ;;  %vm106_vm12 = vcmp.gt.f32.partialorder %v1408_v19, 0.0 }
  0xad   :  { %v1166_v46 = vpop.eup %1165  ;;  %1080 = vmatmul.mubr.msk.f32.gmra.mxu1 %vm52_vm0, %v290_v43  ;;  %v148_v8 = vsel %vm116_vm4, %v1458_v44, 0.0  ;;  %v155_v47 = vsel %vm153_vm13, %v154_v21, %v152_v16  ;;  %1061 = vmatprep.mubr.msk.f32.mxu0 %vm52_vm0, %v277_v45  ;;  %vm179_vm13 = vcmp.eq.f32.partialorder %v1406_v0, inf  ;;  %vm193_vm4 = vcmp.eq.f32.partialorder %v1445_v36, inf }
  0xae   :  { %v157_v17 = vmul.f32 %v1166_v46, %v1371_v61  ;;  %1082 = vmatprep.mubr.msk.f32.mxu1 %vm52_vm0, %v291_v39  ;;  %v134_v49 = vsel %vm102_vm3, %v1166_v46, 0.0  ;;  %v292_v58 = vmul.f32 %v148_v8, %v1274_v22  ;;  %v261_v4 = vmax.f32 %v155_v47, 0.0001 }
  0xaf   :  { %v278_v57 = vmul.f32 %v134_v49, %v1279_v23  ;;  %vm181_vm3 = vcmp.eq.f32.partialorder %v1406_v0, 0.0  ;;  %v196_v45 = vand.u32 2147483648, %v1445_v36 }
  0xb0   :  { %v1168_v62 = vpop.eup %1167  ;;  %v159_v3 = vsel %vm158_vm14, %v1371_v61, %v157_v17  ;;  %vm186_vm14 = vcmp.eq.f32.partialorder %v1408_v19, inf }
  0xb1   :  { %v1170_v22 = vpop.eup %1169  ;;  %1062 = vmatmul.mubr.msk.f32.vlgmr.msra.gmra.mxu0 %vm52_vm0, %v278_v57  ;;  %1083 = vmatmul.mubr.msk.f32.gmra.mxu1 %vm52_vm0, %v292_v58  ;;  %v135_v23 = vsel %vm103_vm5, %v1168_v62, 0.0  ;;  %v162_v5 = vsel %vm160_vm1, %v161_v30, %v159_v3  ;;  %v164_v11 = vmul.f32 %v1168_v62, %v1381_v7  ;;  %vm188_vm1 = vcmp.eq.f32.partialorder %v1408_v19, 0.0 }
  0xb2   :  { %1087 = vmatprep.mubr.msk.f32.mxu1 %vm499_vm15, %v261_v4  ;;  %v279_v14 = vmul.f32 %v135_v23, %v1290_v28  ;;  %v262_v15 = vmax.f32 %v162_v5, 0.0001  ;;  %v136_v6 = vsel %vm104_vm6, %v1170_v22, 0.0  ;;  %v171_v20 = vmul.f32 %v1170_v22, %v1383_v10 }
  0xb3   :  { %v280_v21 = vmul.f32 %v136_v6, %v1295_v29  ;;  %v166_v61 = vsel %vm165_vm7, %v1381_v7, %v164_v11  ;;  %vm209_vm5 = vcmp.eq.f32.partialorder %v1346_v51, 0.0  ;;  %vm214_vm6 = vcmp.eq.f32.partialorder %v1352_v53, inf }
  0xb4   :  { %v1172_v25 = vpop.eup %1171  ;;  %1064 = vmatprep.mubr.msk.f32.mxu0 %vm52_vm0, %v279_v14  ;;  %v169_v28 = vsel %vm167_vm8, %v168_v48, %v166_v61  ;;  %v173_v29 = vsel %vm172_vm9, %v1383_v10, %v171_v20  ;;  %vm221_vm7 = vcmp.eq.f32.partialorder %v1344_v50, inf  ;;  %vm200_vm8 = vcmp.eq.f32.partialorder %v1447_v37, inf }
  0xb5   :  { %v1174_v30 = vpop.eup %1173  ;;  %1088 = vmatmul.mubr.msk.f32.vlgmr.msra.gmra.mxu1 %vm499_vm15, %v262_v15  ;;  %1065 = vmatmul.mubr.msk.f32.gmra.mxu0 %vm52_vm0, %v280_v21  ;;  %v263_v31 = vmax.f32 %v169_v28, 0.0001  ;;  %v137_v7 = vsel %vm105_vm11, %v1172_v25, 0.0  ;;  %v176_v32 = vsel %vm174_vm10, %v175_v59, %v173_v29  ;;  %v178_v2 = vmul.f32 %v1172_v25, %v1406_v0 }
  0xb6   :  { %v281_v38 = vmul.f32 %v137_v7, %v1306_v34  ;;  %v264_v39 = vmax.f32 %v176_v32, 0.0001  ;;  %v138_v42 = vsel %vm106_vm12, %v1174_v30, 0.0  ;;  %v185_v43 = vmul.f32 %v1174_v30, %v1408_v19 }
  0xb7   :  { %1090 = vmatprep.mubr.msk.f32.mxu1 %vm499_vm15, %v263_v31  ;;  %v282_v10 = vmul.f32 %v138_v42, %v1311_v35  ;;  %v180_v16 = vsel %vm179_vm13, %v1406_v0, %v178_v2  ;;  %vm107_vm9 = vcmp.gt.f32.partialorder %v1445_v36, 0.0  ;;  %vm108_vm10 = vcmp.gt.f32.partialorder %v1447_v37, 0.0  ;;  %v717_v2 = vld [vmem:[%s1751_s3 + $0x20] sm:$0x1] }
  0xb8   :  { %v1176_v46 = vpop.eup %1175  ;;  %1067 = vmatprep.mubr.msk.f32.mxu0 %vm52_vm0, %v281_v38  ;;  %v183_v34 = vsel %vm181_vm3, %v182_v1, %v180_v16  ;;  %v187_v8 = vsel %vm186_vm14, %v1408_v19, %v185_v43  ;;  %v203_v62 = vand.u32 2147483648, %v1447_v37  ;;  %vm195_vm11 = vcmp.eq.f32.partialorder %v1445_v36, 0.0  ;;  %1111 = vmatprep.subr.msk.mxu0 %vm548_vm2, %v717_v2  ;;  %v715_v38 = vld [vmem:[%s1751_s3 + $0x10] sm:$0xff]  ;;  %v713_v42 = vld [vmem:[%s1751_s3] sm:$0xff] }
  0xb9   :  { %v1178_v47 = vpop.eup %1177  ;;  %v192_v35 = vmul.f32 %v1176_v46, %v1445_v36  ;;  %1091 = vmatmul.mubr.msk.f32.gmra.mxu1 %vm499_vm15, %v264_v39  ;;  %1068 = vmatmul.mubr.msk.f32.gmra.mxu0 %vm52_vm0, %v282_v10  ;;  %v265_v48 = vmax.f32 %v183_v34, 0.0001  ;;  %v139_v17 = vsel %vm107_vm9, %v1176_v46, 0.0  ;;  %v190_v0 = vsel %vm188_vm1, %v189_v26, %v187_v8  ;;  %v714_v39 = vld [vmem:[%s1751_s3 + $0x8] sm:$0xff] }
  0xba   :  { %v199_v49 = vmul.f32 %v1178_v47, %v1447_v37  ;;  %v283_v58 = vmul.f32 %v139_v17, %v1322_v40  ;;  %v266_v57 = vmax.f32 %v190_v0, 0.0001  ;;  %v140_v59 = vsel %vm108_vm10, %v1178_v47, 0.0  ;;  %1112 = vmatpush3.msk.msra.mxu0 %vm548_vm2, %v717_v2 }
  0xbb   :  { %1093 = vmatprep.mubr.msk.f32.mxu1 %vm499_vm15, %v265_v48  ;;  %v284_v3 = vmul.f32 %v140_v59, %v1327_v41  ;;  %v194_v4 = vsel %vm193_vm4, %v1445_v36, %v192_v35  ;;  %vm202_vm12 = vcmp.eq.f32.partialorder %v1447_v37, 0.0  ;;  %v227_v22 = vmul.f32 %v1374_v63, %v1350_v52  ;;  %v969_v35 = vld [vmem:[%s1752_s2] ss:$0 sm:$0xff] }
  0xbc   :  { %1070 = vmatprep.mubr.msk.f32.mxu0 %vm52_vm0, %v283_v58  ;;  %v197_v19 = vsel %vm195_vm11, %v196_v45, %v194_v4  ;;  %v201_v40 = vsel %vm200_vm8, %v1447_v37, %v199_v49  ;;  %v211_v36 = vsel %vm209_vm5, %v210_v12, %v1439_v9  ;;  %v215_v37 = vsel %vm214_vm6, %v1352_v53, %v1442_v33 }
  0xbd   :  { %1094 = vmatmul.mubr.msk.f32.gmra.mxu1 %vm499_vm15, %v266_v57  ;;  %1071 = vmatmul.mubr.msk.f32.gmra.mxu0 %vm52_vm0, %v284_v3  ;;  %v267_v41 = vmax.f32 %v197_v19, 0.0001  ;;  %v204_v23 = vsel %vm202_vm12, %v203_v62, %v201_v40  ;;  %v217_v63 = vand.u32 2147483648, %v1352_v53  ;;  %v222_v11 = vsel %vm221_vm7, %v1344_v50, %v1416_v24 }
  0xbe   :  { %v268_v5 = vmax.f32 %v204_v23, 0.0001  ;;  %v234_v1 = vmul.f32 %v1397_v18, %v1358_v55  ;;  %vm216_vm0 = vcmp.eq.f32.partialorder %v1352_v53, 0.0  ;;  %v224_v51 = vand.u32 2147483648, %v1344_v50 }
  0xbf   :  { %1096 = vmatprep.mubr.msk.f32.mxu1 %vm499_vm15, %v267_v41  ;;  %v269_v12 = vmax.f32 %v211_v36, 0.0001  ;;  %v218_v9 = vsel %vm216_vm0, %v217_v63, %v215_v37  ;;  %vm223_vm13 = vcmp.eq.f32.partialorder %v1344_v50, 0.0  ;;  %vm228_vm3 = vcmp.eq.f32.partialorder %v1350_v52, inf }
  0xc0   :  { %v225_v33 = vsel %vm223_vm13, %v224_v51, %v222_v11  ;;  %v229_v24 = vsel %vm228_vm3, %v1350_v52, %v227_v22  ;;  %vm235_vm14 = vcmp.eq.f32.partialorder %v1358_v55, inf  ;;  %v241_v18 = vmul.f32 %v1391_v13, %v1356_v54 }
  0xc1   :  { %1097 = vmatmul.mubr.msk.f32.gmra.mxu1 %vm499_vm15, %v268_v5  ;;  %v231_v53 = vand.u32 2147483648, %v1350_v52  ;;  %v236_v14 = vsel %vm235_vm14, %v1358_v55, %v234_v1  ;;  %v248_v50 = vmul.f32 %v1422_v27, %v1362_v56  ;;  %v270_v15 = vmax.f32 %v218_v9, 0.0001 }
  0xc2   :  { %1099 = vmatprep.mubr.msk.f32.mxu1 %vm499_vm15, %v269_v12  ;;  %vm230_vm1 = vcmp.eq.f32.partialorder %v1350_v52, 0.0  ;;  %v238_v6 = vand.u32 2147483648, %v1358_v55  ;;  %v271_v20 = vmax.f32 %v225_v33, 0.0001  ;;  %vm237_vm4 = vcmp.eq.f32.partialorder %v1358_v55, 0.0 }
  0xc3   :  { %v232_v21 = vsel %vm230_vm1, %v231_v53, %v229_v24  ;;  %vm242_vm5 = vcmp.eq.f32.partialorder %v1356_v54, inf  ;;  %vm249_vm6 = vcmp.eq.f32.partialorder %v1362_v56, inf  ;;  %v255_v27 = vmul.f32 %v1458_v44, %v1369_v60 }
  0xc4   :  { %v239_v13 = vsel %vm237_vm4, %v238_v6, %v236_v14  ;;  %v243_v61 = vsel %vm242_vm5, %v1356_v54, %v241_v18  ;;  %v245_v52 = vand.u32 2147483648, %v1356_v54  ;;  %v250_v25 = vsel %vm249_vm6, %v1362_v56, %v248_v50 }
  0xc5   :  { %1100 = vmatmul.mubr.msk.f32.gmra.mxu1 %vm499_vm15, %v270_v15  ;;  %v272_v28 = vmax.f32 %v232_v21, 0.0001  ;;  %vm244_vm7 = vcmp.eq.f32.partialorder %v1356_v54, 0.0  ;;  %v252_v55 = vand.u32 2147483648, %v1362_v56  ;;  %v273_v29 = vmax.f32 %v239_v13, 0.0001 }
  0xc6   :  { %1102 = vmatprep.mubr.msk.f32.mxu1 %vm499_vm15, %v271_v20  ;;  %v246_v26 = vsel %vm244_vm7, %v245_v52, %v243_v61  ;;  %vm251_vm8 = vcmp.eq.f32.partialorder %v1362_v56, 0.0  ;;  %vm256_vm9 = vcmp.eq.f32.partialorder %v1369_v60, inf  ;;  %v259_v31 = vand.u32 2147483648, %v1369_v60 }
  0xc7   :  { %v253_v44 = vsel %vm251_vm8, %v252_v55, %v250_v25  ;;  %v257_v30 = vsel %vm256_vm9, %v1369_v60, %v255_v27  ;;  %v274_v7 = vmax.f32 %v246_v26, 0.0001  ;;  %vm258_vm10 = vcmp.eq.f32.partialorder %v1369_v60, 0.0  ;;  %v716_v60 = vld [vmem:[%s1751_s3 + $0x18] sm:$0xff] }
  0xc8   :  { %v275_v54 = vmax.f32 %v253_v44, 0.0001  ;;  %v260_v32 = vsel %vm258_vm10, %v259_v31, %v257_v30  ;;  %1113 = vmatprep.subr.mxu0 %v716_v60  ;;  %vm718_vm2 = vcmask 269312  }
  0xc9   :  { %1103 = vmatmul.mubr.msk.f32.gmra.mxu1 %vm499_vm15, %v272_v28  ;;  %v276_v56 = vmax.f32 %v260_v32, 0.0001  ;;  %1114 = vmatpush3.msra.mxu0 %v716_v60 }
  0xca   :  { %1105 = vmatprep.mubr.msk.f32.mxu1 %vm499_vm15, %v273_v29  ;;  %1115 = vmatprep.subr.mxu0 %v715_v38 }
  0xcb   :  { %1116 = vmatpush3.msra.mxu0 %v715_v38 }
  0xcc   :  { %1117 = vmatprep.subr.mxu0 %v714_v39 }
  0xcd   :  { %1106 = vmatmul.mubr.msk.f32.gmra.mxu1 %vm499_vm15, %v274_v7  ;;  %1118 = vmatpush3.msra.mxu0 %v714_v39 }
  0xce   :  { %1108 = vmatprep.mubr.msk.f32.mxu1 %vm499_vm15, %v275_v54  ;;  %1119 = vmatprep.subr.mxu0 %v713_v42 }
  0xcf   :  { %1120 = vmatpush3.msra.mxu0 %v713_v42 }
  0xd1   :  { %1109 = vmatmul.mubr.msk.f32.gmra.mxu1 %vm499_vm15, %v276_v56  ;;  %vm931_vm15 = vcmask 392192  }
 0x165   :  { %v1641_v43 = vpop.f32.mrf.mxu1 }
 0x167   :  { %v1643_v45 = vpop.f32.mrf.mxu1 }
 0x169   :  { %v1645_v10 = vpop.f32.mrf.mxu1 }
 0x16b   :  { %v1647_v16 = vpop.f32.mrf.mxu1 }
 0x16d   :  { %v1649_v46 = vpop.f32.mrf.mxu1 }
 0x16f   :  { %v1651_v34 = vpop.f32.mrf.mxu1 }
 0x171   :  { %v1653_v8 = vpop.f32.mrf.mxu1  ;;  %v1063_v32 = vpop.f32.mrf.mxu0 }
 0x173   :  { %v1655_v47 = vpop.f32.mrf.mxu1  ;;  %v412_v56 = vpop.f32.mrf.mxu0 }
 0x175   :  { %v1089_v48 = vpop.f32.mrf.mxu1  ;;  %v1066_v2 = vpop.f32.mrf.mxu0 }
 0x176   :  { %v624_v17 = vadd.f32 %v1089_v48, %v969_v35 }
 0x177   :  { %v618_v0 = vpop.f32.mrf.mxu1  ;;  %v422_v60 = vpop.f32.mrf.mxu0 }
 0x178   :  { %v619_v49 = vadd.f32 %v969_v35, %v618_v0  ;;  %v698_v59 = vmax.f32 %v624_v17, 0.0 }
 0x179   :  { %v1092_v58 = vpop.f32.mrf.mxu1  ;;  %v1069_v38 = vpop.f32.mrf.mxu0 }
 0x17a   :  { %v697_v57 = vmax.f32 %v619_v49, 0.0  ;;  %v634_v62 = vadd.f32 %v1092_v58, %v969_v35 }
 0x17b   :  { %v628_v3 = vpop.f32.mrf.mxu1  ;;  %v432_v39 = vpop.f32.mrf.mxu0 }
 0x17c   :  { %v629_v4 = vadd.f32 %v969_v35, %v628_v3  ;;  %1121 = vmatprep.mubr.msk.f32.mxu0 %vm718_vm2, %v697_v57  ;;  %v700_v22 = vmax.f32 %v634_v62, 0.0 }
 0x17d   :  { %v1095_v19 = vpop.f32.mrf.mxu1  ;;  %1122 = vmatmul.mubr.msk.f32.vlgmr.msra.gmra.mxu0 %vm718_vm2, %v698_v59  ;;  %v1072_v42 = vpop.f32.mrf.mxu0 }
 0x17e   :  { %v699_v40 = vmax.f32 %v629_v4, 0.0  ;;  %v644_v41 = vadd.f32 %v1095_v19, %v969_v35 }
 0x17f   :  { %v638_v23 = vpop.f32.mrf.mxu1  ;;  %v442_v48 = vpop.f32.mrf.mxu0 }
 0x180   :  { %v639_v36 = vadd.f32 %v969_v35, %v638_v23  ;;  %1124 = vmatprep.mubr.msk.f32.mxu0 %vm718_vm2, %v699_v40  ;;  %v702_v63 = vmax.f32 %v644_v41, 0.0 }
 0x181   :  { %v1098_v37 = vpop.f32.mrf.mxu1  ;;  %1125 = vmatmul.mubr.msk.f32.gmra.mxu0 %vm718_vm2, %v700_v22 }
 0x182   :  { %v701_v5 = vmax.f32 %v639_v36, 0.0  ;;  %v654_v11 = vadd.f32 %v1098_v37, %v969_v35 }
 0x183   :  { %v648_v1 = vpop.f32.mrf.mxu1 }
 0x184   :  { %v649_v51 = vadd.f32 %v969_v35, %v648_v1  ;;  %1127 = vmatprep.mubr.msk.f32.mxu0 %vm718_vm2, %v701_v5  ;;  %v704_v33 = vmax.f32 %v654_v11, 0.0 }
 0x185   :  { %v1101_v12 = vpop.f32.mrf.mxu1  ;;  %1128 = vmatmul.mubr.msk.f32.gmra.mxu0 %vm718_vm2, %v702_v63 }
 0x186   :  { %v703_v9 = vmax.f32 %v649_v51, 0.0  ;;  %v664_v24 = vadd.f32 %v1101_v12, %v969_v35 }
 0x187   :  { %v658_v18 = vpop.f32.mrf.mxu1 }
 0x188   :  { %v659_v53 = vadd.f32 %v969_v35, %v658_v18  ;;  %1130 = vmatprep.mubr.msk.f32.mxu0 %vm718_vm2, %v703_v9  ;;  %v706_v15 = vmax.f32 %v664_v24, 0.0 }
 0x189   :  { %v1104_v14 = vpop.f32.mrf.mxu1  ;;  %1131 = vmatmul.mubr.msk.f32.gmra.mxu0 %vm718_vm2, %v704_v33 }
 0x18a   :  { %v705_v50 = vmax.f32 %v659_v53, 0.0  ;;  %v674_v6 = vadd.f32 %v1104_v14, %v969_v35 }
 0x18b   :  { %v668_v20 = vpop.f32.mrf.mxu1 }
 0x18c   :  { %v669_v21 = vadd.f32 %v969_v35, %v668_v20  ;;  %1133 = vmatprep.mubr.msk.f32.mxu0 %vm718_vm2, %v705_v50  ;;  %v708_v27 = vmax.f32 %v674_v6, 0.0 }
 0x18d   :  { %v1107_v13 = vpop.f32.mrf.mxu1  ;;  %1134 = vmatmul.mubr.msk.f32.gmra.mxu0 %vm718_vm2, %v706_v15 }
 0x18e   :  { %v707_v61 = vmax.f32 %v669_v21, 0.0  ;;  %v684_v52 = vadd.f32 %v1107_v13, %v969_v35 }
 0x18f   :  { %v678_v25 = vpop.f32.mrf.mxu1 }
 0x190   :  { %v679_v28 = vadd.f32 %v969_v35, %v678_v25  ;;  %1136 = vmatprep.mubr.msk.f32.mxu0 %vm718_vm2, %v707_v61  ;;  %v710_v26 = vmax.f32 %v684_v52, 0.0 }
 0x191   :  { %v1110_v55 = vpop.f32.mrf.mxu1  ;;  %1137 = vmatmul.mubr.msk.f32.gmra.mxu0 %vm718_vm2, %v708_v27 }
 0x192   :  { %v709_v29 = vmax.f32 %v679_v28, 0.0  ;;  %v694_v44 = vadd.f32 %v1110_v55, %v969_v35 }
 0x193   :  { %v688_v30 = vpop.f32.mrf.mxu1 }
 0x194   :  { %v689_v31 = vadd.f32 %v969_v35, %v688_v30  ;;  %1139 = vmatprep.mubr.msk.f32.mxu0 %vm718_vm2, %v709_v29  ;;  %v712_v54 = vmax.f32 %v694_v44, 0.0 }
 0x195   :  { %1140 = vmatmul.mubr.msk.f32.gmra.mxu0 %vm718_vm2, %v710_v26 }
 0x196   :  { %v711_v7 = vmax.f32 %v689_v31, 0.0 }
 0x198   :  { %1142 = vmatprep.mubr.msk.f32.mxu0 %vm718_vm2, %v711_v7 }
 0x199   :  { %1143 = vmatmul.mubr.msk.f32.gmra.mxu0 %vm718_vm2, %v712_v54 }
 0x23d   :  { %v1123_v17 = vpop.f32.mrf.mxu0 }
 0x23e   :  { %v916_v35 = vmul.f32 %v1123_v17, %v1063_v32 }
 0x23f   :  { %v836_v0 = vpop.f32.mrf.mxu0 }
 0x240   :  { %933 = vst.msk [vmem:[%s1753_s5 + $0x8] sm:$0xff] %vm931_vm15, %v916_v35  ;;  %v915_v49 = vmul.f32 %v836_v0, %v412_v56 }
 0x241   :  { %v1126_v58 = vpop.f32.mrf.mxu0 }
 0x242   :  { %932 = vst.msk [vmem:[%s1753_s5] sm:$0xff] %vm931_vm15, %v915_v49  ;;  %v918_v57 = vmul.f32 %v1126_v58, %v1066_v2 }
 0x243   :  { %v846_v59 = vpop.f32.mrf.mxu0 }
 0x244   :  { %935 = vst.msk [vmem:[%s1753_s5 + $0x18] sm:$0xff] %vm931_vm15, %v918_v57  ;;  %v917_v62 = vmul.f32 %v846_v59, %v422_v60 }
 0x245   :  { %v1129_v3 = vpop.f32.mrf.mxu0 }
 0x246   :  { %934 = vst.msk [vmem:[%s1753_s5 + $0x10] sm:$0xff] %vm931_vm15, %v917_v62  ;;  %v920_v4 = vmul.f32 %v1129_v3, %v1069_v38 }
 0x247   :  { %v856_v19 = vpop.f32.mrf.mxu0 }
 0x248   :  { %937 = vst.msk [vmem:[%s1753_s5 + $0x28] sm:$0xff] %vm931_vm15, %v920_v4  ;;  %v919_v40 = vmul.f32 %v856_v19, %v432_v39 }
 0x249   :  { %v1132_v22 = vpop.f32.mrf.mxu0 }
 0x24a   :  { %936 = vst.msk [vmem:[%s1753_s5 + $0x20] sm:$0xff] %vm931_vm15, %v919_v40  ;;  %v922_v41 = vmul.f32 %v1132_v22, %v1072_v42 }
 0x24b   :  { %v866_v23 = vpop.f32.mrf.mxu0 }
 0x24c   :  { %939 = vst.msk [vmem:[%s1753_s5 + $0x38] sm:$0xff] %vm931_vm15, %v922_v41  ;;  %v921_v36 = vmul.f32 %v866_v23, %v442_v48 }
 0x24d   :  { %v1135_v37 = vpop.f32.mrf.mxu0 }
 0x24e   :  { %938 = vst.msk [vmem:[%s1753_s5 + $0x30] sm:$0xff] %vm931_vm15, %v921_v36  ;;  %v924_v5 = vmul.f32 %v1135_v37, %v1641_v43 }
 0x24f   :  { %v876_v63 = vpop.f32.mrf.mxu0 }
 0x250   :  { %941 = vst.msk [vmem:[%s1753_s5 + $0x48] sm:$0xff] %vm931_vm15, %v924_v5  ;;  %v923_v11 = vmul.f32 %v876_v63, %v1643_v45 }
 0x251   :  { %v1138_v1 = vpop.f32.mrf.mxu0 }
 0x252   :  { %940 = vst.msk [vmem:[%s1753_s5 + $0x40] sm:$0xff] %vm931_vm15, %v923_v11  ;;  %v926_v51 = vmul.f32 %v1138_v1, %v1645_v10 }
 0x253   :  { %v886_v12 = vpop.f32.mrf.mxu0 }
 0x254   :  { %943 = vst.msk [vmem:[%s1753_s5 + $0x58] sm:$0xff] %vm931_vm15, %v926_v51  ;;  %v925_v43 = vmul.f32 %v886_v12, %v1647_v16 }
 0x255   :  { %v1141_v9 = vpop.f32.mrf.mxu0 }
 0x256   :  { %942 = vst.msk [vmem:[%s1753_s5 + $0x50] sm:$0xff] %vm931_vm15, %v925_v43  ;;  %v928_v45 = vmul.f32 %v1141_v9, %v1649_v46 }
 0x257   :  { %v896_v33 = vpop.f32.mrf.mxu0 }
 0x258   :  { %945 = vst.msk [vmem:[%s1753_s5 + $0x68] sm:$0xff] %vm931_vm15, %v928_v45  ;;  %v927_v10 = vmul.f32 %v896_v33, %v1651_v34 }
 0x259   :  { %v1144_v24 = vpop.f32.mrf.mxu0 }
 0x25a   :  { %944 = vst.msk [vmem:[%s1753_s5 + $0x60] sm:$0xff] %vm931_vm15, %v927_v10  ;;  %v930_v16 = vmul.f32 %v1144_v24, %v1653_v8 }
 0x25b   :  { %v906_v18 = vpop.f32.mrf.mxu0 }
 0x25c   :  { %947 = vst.msk [vmem:[%s1753_s5 + $0x78] sm:$0xff] %vm931_vm15, %v930_v16  ;;  %v929_v46 = vmul.f32 %v906_v18, %v1655_v47 }
 0x25e   :  { %946 = vst.msk [vmem:[%s1753_s5 + $0x70] sm:$0xff] %vm931_vm15, %v929_v46 }

</bundles_post_ra>
